<compile_context>
chip_gen: v7x
topology: tpu7x:2x2x1
jax: 0.10.0
libtpu: 0.0.40
codegen_flags: <defaults>
</compile_context>

<pallas_src>
import jax
import jax.numpy as jnp
from jax.experimental import pallas as pl
from jax.experimental.pallas import tpu as pltpu


def _round_up(n, m):
    return ((n + m - 1) // m) * m


def _pad2d(a, rows, cols, dtype):
    a = a.astype(dtype)
    pr, pc = rows - a.shape[0], cols - a.shape[1]
    if pr or pc:
        a = jnp.pad(a, ((0, pr), (0, pc)))
    return a


def _encoder_kernel(x_ref, w1_ref, b1_ref, w2_ref, b2_ref, out_ref):
    # Cast the streamed f32 tile to the MXU compute dtype in-kernel (cheap VPU
    # op, hidden under DMA) instead of materializing a bf16 copy of x in HBM.
    x = x_ref[...].astype(w1_ref.dtype)

    # ---- layer 1: Linear(input_size -> hidden) + Tanh ----------------------
    h = jnp.dot(x, w1_ref[...], preferred_element_type=jnp.float32)
    h = jnp.tanh(h + b1_ref[...])                       # f32 (VPU + EUP)

    # ---- layer 2: Linear(hidden -> latent) + Tanh ---------------------------
    z = jnp.dot(h.astype(w2_ref.dtype), w2_ref[...],
                preferred_element_type=jnp.float32)
    out_ref[...] = jnp.tanh(z + b2_ref[...]).astype(out_ref.dtype)


def _footprint_bytes(tb, in_size, h_pad, lat, cd_item, out_item):
    """Per-step VMEM footprint: double-buffered streamed tiles, resident
    (double-buffered) weights/biases, plus live in-kernel intermediates."""
    x_tile = 2 * tb * in_size * 4                       # f32 input tile
    out_tile = 2 * tb * lat * out_item
    weights = 2 * (in_size * h_pad + h_pad * lat) * cd_item
    biases = 2 * (h_pad + lat) * 4
    inter = tb * (in_size * cd_item                     # bf16 copy of x tile
                  + h_pad * (4 + cd_item)               # h in f32 + bf16
                  + lat * 4)                            # z in f32
    return x_tile + out_tile + weights + biases + inter


def encoder_forward(x, params, *, tile_b=None, compute_dtype=jnp.bfloat16,
                    out_dtype=jnp.float32):
    """x: (B, input_size) f32.  params: w1 (in,hid), b1 (hid,), w2 (hid,lat),
    b2 (lat,).  Returns (B, latent_size) in out_dtype (default f32)."""
    B, in_size = x.shape
    w1, b1, w2, b2 = params["w1"], params["b1"], params["w2"], params["b2"]
    H = w1.shape[1]
    L = w2.shape[1]

    # Only the hidden dim needs 128-lane padding (it is both an MXU output
    # width and the second contraction's K).  x's K and the output's L keep
    # their true extents (full-dim BlockSpecs are legal).
    h_pad = _round_up(H, 128)

    cd_item = jnp.dtype(compute_dtype).itemsize
    out_item = jnp.dtype(out_dtype).itemsize

    # ---- VMEM budget (generation-aware) -------------------------------------
    try:
        vmem_cap = int(pltpu.get_tpu_info().vmem_capacity_bytes)
    except Exception:  # fall back to the smallest per-TC VMEM (v7x: 64 MiB)
        vmem_cap = 64 << 20
    budget = min(vmem_cap - (24 << 20), 64 << 20)       # ~40 MiB on v7x
    budget = max(budget, 8 << 20)

    # ---- batch tile sizing ---------------------------------------------------
    if tile_b is None:
        # Target a ~4 MiB f32 input tile, then shrink until everything fits.
        tile_b = max(8, (4 << 20) // max(1, in_size * 4))
    tile_b = _round_up(tile_b, 8)
    while tile_b > 8 and _footprint_bytes(
            tile_b, in_size, h_pad, L, cd_item, out_item) > budget:
        tile_b = max(8, _round_up(tile_b // 2, 8))

    steps = -(-B // tile_b)                              # cdiv
    if steps < 2 and B >= 16:
        steps = 2                                        # feed both v7x TCs
    tb = _round_up(-(-B // steps), 8)                    # minimize batch padding
    b_pad = tb * steps

    # ---- operands (no materialized pad/cast of x; weights are tiny) ---------
    x_in = x if b_pad == B else jnp.pad(x, ((0, b_pad - B), (0, 0)))
    w1_p = _pad2d(w1, in_size, h_pad, compute_dtype)
    w2_p = _pad2d(w2, h_pad, L, compute_dtype)
    b1_p = _pad2d(b1.reshape(1, H), 1, h_pad, jnp.float32)
    b2_p = b2.reshape(1, L).astype(jnp.float32)

    vmem_bytes = _footprint_bytes(tb, in_size, h_pad, L, cd_item, out_item)
    vmem_bytes = min(vmem_bytes + (4 << 20), vmem_cap - (8 << 20))

    out = pl.pallas_call(
        _encoder_kernel,
        out_shape=jax.ShapeDtypeStruct((b_pad, L), out_dtype),
        grid=(steps,),
        in_specs=[
            pl.BlockSpec((tb, in_size), lambda i: (i, 0)),    # x: streamed f32
            pl.BlockSpec((in_size, h_pad), lambda i: (0, 0)),  # w1: resident
            pl.BlockSpec((1, h_pad), lambda i: (0, 0)),        # b1: resident
            pl.BlockSpec((h_pad, L), lambda i: (0, 0)),        # w2: resident
            pl.BlockSpec((1, L), lambda i: (0, 0)),            # b2: resident
        ],
        out_specs=pl.BlockSpec((tb, L), lambda i: (i, 0)),
        compiler_params=pltpu.CompilerParams(
            dimension_semantics=("parallel",),
            vmem_limit_bytes=int(vmem_bytes),
        ),
    )(x_in, w1_p, b1_p, w2_p, b2_p)

    # No L slice ever needed; batch slice only when the batch was padded.
    return out if b_pad == B else out[:B]


def init_params(key, input_size, latent_size, layer_sizes=(128,)):
    """Deterministic synthetic parameters (PyTorch-Linear-like uniform init),
    stored as (in, out) so the kernel computes y = x @ W + b."""
    sizes = [input_size] + list(layer_sizes) + [latent_size]
    params = {}
    for i in range(len(sizes) - 1):
        fan_in, fan_out = sizes[i], sizes[i + 1]
        key, kw, kb = jax.random.split(key, 3)
        bound = 1.0 / jnp.sqrt(fan_in)
        params[f"w{i + 1}"] = jax.random.uniform(
            kw, (fan_in, fan_out), jnp.float32, -bound, bound)
        params[f"b{i + 1}"] = jax.random.uniform(
            kb, (fan_out,), jnp.float32, -bound, bound)
    return params


def reference_matched(x, p, compute_dtype=jnp.bfloat16):
    """Plain-JAX reference using the same bf16-operand / f32-accumulate recipe
    as the kernel (tight tolerance check)."""
    xc = x.astype(compute_dtype)
    h = jnp.dot(xc, p["w1"].astype(compute_dtype),
                preferred_element_type=jnp.float32) + p["b1"][None, :]
    h = jnp.tanh(h).astype(compute_dtype)
    z = jnp.dot(h, p["w2"].astype(compute_dtype),
                preferred_element_type=jnp.float32) + p["b2"][None, :]
    return jnp.tanh(z)


def reference_f32(x, p):
    """Full-f32 reference matching the PyTorch module exactly (loose check)."""
    h = jnp.tanh(x @ p["w1"] + p["b1"][None, :])
    return jnp.tanh(h @ p["w2"] + p["b2"][None, :])


if __name__ == "__main__":
    key = jax.random.PRNGKey(0)
    key, kx = jax.random.split(key)

    batch, input_size, latent_size = 8, 32, 16
    x = jax.random.normal(kx, (batch, input_size), jnp.float32)
    params = init_params(key, input_size, latent_size)

    out = encoder_forward(x, params)
    out = jax.block_until_ready(out)

    assert out.shape == (batch, latent_size)
    ref_m = reference_matched(x, params)
    assert jnp.allclose(out, ref_m, atol=1e-3, rtol=1e-3), \
        "mismatch vs bf16-matched reference"
    ref_f = reference_f32(x, params)
    assert jnp.allclose(out, ref_f, atol=3e-2, rtol=3e-2), \
        "mismatch vs f32 module reference"

    print("KERNEL_OK")
</pallas_src>

<mosaic_0001>
module attributes {stable_mosaic.version = 11 : i64} {
  func.func @_encoder_kernel(%arg0: i32, %arg1: memref<8x32xf32, #tpu.memory_space<vmem>>, %arg2: memref<32x128xbf16, #tpu.memory_space<vmem>>, %arg3: memref<1x128xf32, #tpu.memory_space<vmem>>, %arg4: memref<128x16xbf16, #tpu.memory_space<vmem>>, %arg5: memref<1x16xf32, #tpu.memory_space<vmem>>, %arg6: memref<8x16xf32, #tpu.memory_space<vmem>>) attributes {dimension_semantics = [#tpu.dimension_semantics<parallel>], iteration_bounds = array<i64: 1>, scalar_prefetch = 0 : i64, scratch_operands = 0 : i64, tpu.core_type = #tpu.core_type<tc>, window_params = [{transform_indices = @transform_0, window_bounds = array<i64: 8, 32>}, {pipeline_mode = #tpu.pipeline_mode<synchronous>, transform_indices = @transform_1, window_bounds = array<i64: 32, 128>}, {pipeline_mode = #tpu.pipeline_mode<synchronous>, transform_indices = @transform_2, window_bounds = array<i64: 1, 128>}, {pipeline_mode = #tpu.pipeline_mode<synchronous>, transform_indices = @transform_3, window_bounds = array<i64: 128, 16>}, {pipeline_mode = #tpu.pipeline_mode<synchronous>, transform_indices = @transform_4, window_bounds = array<i64: 1, 16>}, {transform_indices = @transform_5, window_bounds = array<i64: 8, 16>}]} {
    %c0 = arith.constant 0 : index
    %c0_0 = arith.constant 0 : index
    %0 = vector.load %arg1[%c0, %c0_0] : memref<8x32xf32, #tpu.memory_space<vmem>>, vector<8x32xf32>
    %1 = arith.truncf %0 : vector<8x32xf32> to vector<8x32xbf16>
    %c0_1 = arith.constant 0 : index
    %c0_2 = arith.constant 0 : index
    %2 = vector.load %arg2[%c0_1, %c0_2] : memref<32x128xbf16, #tpu.memory_space<vmem>>, vector<32x128xbf16>
    %cst = arith.constant dense<0.000000e+00> : vector<8x128xf32>
    %3 = tpu.matmul %1, %2, %cst {dimension_numbers = #tpu.dot_dimension_numbers<[1], [0], [0], [1], [0, 0, 1, 1], [], []>} : vector<8x32xbf16>, vector<32x128xbf16>, vector<8x128xf32> -> vector<8x128xf32>
    %c0_3 = arith.constant 0 : index
    %c0_4 = arith.constant 0 : index
    %4 = vector.load %arg3[%c0_3, %c0_4] : memref<1x128xf32, #tpu.memory_space<vmem>>, vector<1x128xf32>
    %5 = vector.broadcast %4 : vector<1x128xf32> to vector<8x128xf32>
    %6 = arith.addf %3, %5 : vector<8x128xf32>
    %7 = math.tanh %6 : vector<8x128xf32>
    %8 = arith.truncf %7 : vector<8x128xf32> to vector<8x128xbf16>
    %c0_5 = arith.constant 0 : index
    %c0_6 = arith.constant 0 : index
    %9 = vector.load %arg4[%c0_5, %c0_6] : memref<128x16xbf16, #tpu.memory_space<vmem>>, vector<128x16xbf16>
    %cst_7 = arith.constant dense<0.000000e+00> : vector<8x16xf32>
    %10 = tpu.matmul %8, %9, %cst_7 {dimension_numbers = #tpu.dot_dimension_numbers<[1], [0], [0], [1], [0, 0, 1, 1], [], []>} : vector<8x128xbf16>, vector<128x16xbf16>, vector<8x16xf32> -> vector<8x16xf32>
    %c0_8 = arith.constant 0 : index
    %c0_9 = arith.constant 0 : index
    %11 = vector.load %arg5[%c0_8, %c0_9] : memref<1x16xf32, #tpu.memory_space<vmem>>, vector<1x16xf32>
    %12 = vector.broadcast %11 : vector<1x16xf32> to vector<8x16xf32>
    %13 = arith.addf %10, %12 : vector<8x16xf32>
    %14 = math.tanh %13 : vector<8x16xf32>
    %c0_10 = arith.constant 0 : index
    %c0_11 = arith.constant 0 : index
    %15 = vector.load %arg6[%c0_10, %c0_11] : memref<8x16xf32, #tpu.memory_space<vmem>>, vector<8x16xf32>
    tpu.vector_store %arg6[%c0_10, %c0_11], %14 {strides = array<i32>} : memref<8x16xf32, #tpu.memory_space<vmem>>, vector<8x16xf32>,
    return
  }
  func.func @transform_0(%arg0: i32) -> (i32, i32) {
    %c0_i32 = arith.constant 0 : i32
    %c0_i32_0 = arith.constant 0 : i32
    return %arg0, %c0_i32 : i32, i32
  }
  func.func @transform_1(%arg0: i32) -> (i32, i32) {
    %c0_i32 = arith.constant 0 : i32
    %c0_i32_0 = arith.constant 0 : i32
    %c0_i32_1 = arith.constant 0 : i32
    return %c0_i32, %c0_i32_0 : i32, i32
  }
  func.func @transform_2(%arg0: i32) -> (i32, i32) {
    %c0_i32 = arith.constant 0 : i32
    %c0_i32_0 = arith.constant 0 : i32
    %c0_i32_1 = arith.constant 0 : i32
    return %c0_i32, %c0_i32_0 : i32, i32
  }
  func.func @transform_3(%arg0: i32) -> (i32, i32) {
    %c0_i32 = arith.constant 0 : i32
    %c0_i32_0 = arith.constant 0 : i32
    %c0_i32_1 = arith.constant 0 : i32
    return %c0_i32, %c0_i32_0 : i32, i32
  }
  func.func @transform_4(%arg0: i32) -> (i32, i32) {
    %c0_i32 = arith.constant 0 : i32
    %c0_i32_0 = arith.constant 0 : i32
    %c0_i32_1 = arith.constant 0 : i32
    return %c0_i32, %c0_i32_0 : i32, i32
  }
  func.func @transform_5(%arg0: i32) -> (i32, i32) {
    %c0_i32 = arith.constant 0 : i32
    %c0_i32_0 = arith.constant 0 : i32
    return %arg0, %c0_i32 : i32, i32
  }
}

</mosaic_0001>

<bundles_post_ra>
// kernel: tpu_custom_call.1
= control target key start
LH: loop header
LB: loop body
LE: loop exit
PB: predicated region body
PF: predicated region fallthrough
CT: control target
= control target key end

     0   :  { %v315_v1 = vmov 0.0   ;;  %vm316_vm0 = vmmov 0   ;;  %vm47_vm1 = vcmask 261120   ;;  %s399_s0 = inlined_call_operand.vmem [shape: f32[8,32], index: 0, kind: input, shape index: {}]   ;;  %s400_s1 = inlined_call_operand.vmem [shape: bf16[32,128], index: 1, kind: input, shape index: {}]   ;;  %s401_s2 = inlined_call_operand.vmem [shape: f32[1,128], index: 2, kind: input, shape index: {}]   ;;  %s402_s3 = inlined_call_operand.vmem [shape: bf16[128,16], index: 3, kind: input, shape index: {}]   ;;  %s403_s4 = inlined_call_operand.vmem [shape: f32[1,16], index: 4, kind: input, shape index: {}]   ;;  %s404_s5 = inlined_call_operand.hbm [shape: f32[8,16], index: 5, kind: output, shape index: {}]  }
   0x1   :  { %v277_v0 = vld [vmem:[%s400_s1] sm:$0xff]   ;;  %246 = vmatprep.subr.bf16.mxu0 %v315_v1  ;;  %v278_v2 = vld [vmem:[%s400_s1 + $0x8] sm:$0xff]   ;;  %254 = vmatprep.subr.bf16.mxu1 %v315_v1  ;;  %v281_v7 = vld [vmem:[%s402_s3 + $0x10] sm:$0xff]  }
   0x2   :  { %247 = vmatpush3.bf16.msra.mxu0 %v277_v0  ;;  %250 = vmatprep.mubr.msk.bf16.mxu0 %vm316_vm0, %v315_v1  ;;  %v22_v3 = vld [vmem:[%s399_s0] sm:$0xff]  ;;  %v280_v6 = vld [vmem:[%s402_s3 + $0x8] sm:$0xff]  }
   0x3   :  { %248 = vmatprep.subr.bf16.mxu0 %v315_v1  ;;  %v279_v4 = vld [vmem:[%s402_s3] sm:$0xff]   ;;  %270 = vmatprep.mubr.msk.bf16.mxu1 %vm316_vm0, %v315_v1  ;;  %v23_v5 = vpack.c.bf16 %v22_v3, %v22_v3 }
   0x4   :  { %255 = vmatpush3.bf16.msra.mxu1 %v279_v4 }
   0x5   :  { %256 = vmatprep.subr.bf16.mxu1 %v315_v1 }
   0x6   :  { %249 = vmatpush3.bf16.msra.mxu0 %v278_v2 }
   0x8   :  { %257 = vmatpush3.bf16.msra.mxu1 %v280_v6 }
   0x9   :  { %251 = vmatmul.mubr.msk.bf16.vlgmr.msra.gmra.mrb[0].mxu0 %vm47_vm1, %v23_v5 }
   0xa   :  { %10 = vsyncpa [#allocation3], 0  ;;  %258 = vmatprep.subr.bf16.mxu1 %v315_v1  ;;  %v282_v8 = vld [vmem:[%s402_s3 + $0x18] sm:$0xff]   ;;  %v283_v9 = vld [vmem:[%s402_s3 + $0x20] sm:$0xff]   ;;  %vm205_vm2 = vcmask 130048  }
   0xb   :  { %v284_v10 = vld [vmem:[%s402_s3 + $0x28] sm:$0xff]   ;;  %v285_v11 = vld [vmem:[%s402_s3 + $0x30] sm:$0xff]   ;;  %v286_v12 = vld [vmem:[%s402_s3 + $0x38] sm:$0xff]  }
   0xc   :  { %259 = vmatpush3.bf16.msra.mxu1 %v281_v7  ;;  %v221_v13 = vld [vmem:[%s401_s2] ss:$0 sm:$0xff]  ;;  %s317_s2 = smov [#allocation2]  }
   0xd   :  { %260 = vmatprep.subr.bf16.mxu1 %v315_v1  ;;  %v225_v21 = vld [vmem:[%s403_s4] ss:$0 sm:$0xff]  ;;  %s213_s3 = sshll.u32 %s317_s2, 4  ;;  %s214_s3 = int_to_ptr.vmem [resolvable:$true] %s213_s3 }
   0xe   :  { %s291_s17 = scalar_lea.vmem %s214_s3, 128  ;;  %p296_p1 = scmp.lt.s32.totalorder %s214_s3, %s214_s3 }
   0xf   :  { %p292_p0 = scmp.ne.s32.totalorder %s214_s3, %s291_s17  ;;  %p297_p2 = scmp.lt.s32.totalorder %s291_s17, %s291_s17 }
  0x10   :  { %261 = vmatpush3.bf16.msra.mxu1 %v282_v8 }
  0x11   :  { %262 = vmatprep.subr.bf16.mxu1 %v315_v1  ;;  %p298_p3 = por %p297_p2, %p296_p1 }
  0x13   :  { %p299_p4 = pnand %p298_p3, %p292_p0 }
  0x14   :  { %263 = vmatpush3.bf16.msra.mxu1 %v283_v9 }
  0x15   :  { %264 = vmatprep.subr.bf16.mxu1 %v315_v1 }
  0x18   :  { %265 = vmatpush3.bf16.msra.mxu1 %v284_v10 }
  0x19   :  { %266 = vmatprep.subr.bf16.mxu1 %v315_v1 }
  0x1c   :  { %267 = vmatpush3.bf16.msra.mxu1 %v285_v11 }
  0x1d   :  { %268 = vmatprep.subr.bf16.mxu1 %v315_v1 }
  0x20   :  { %269 = vmatpush3.bf16.msra.mxu1 %v286_v12 }
  0xdc   :  { %v85_v14 = vpop.f32.mrb[0].mxu0 }
  0xdd   :  { %v86_v15 = vadd.f32 %v221_v13, %v85_v14  ;;  %v252_v16 = vpop.f32.mrb[1].mxu0 }
  0xde   :  { %v88_v17 = vpop.f32.mrb[2].mxu0 }
  0xdf   :  { %287 = vtanh.f32 %v86_v15  ;;  %v253_v18 = vpop.f32.mrb[3].mxu0 }
  0xe9   :  { %v288_v19 = vpop.eup %287 }
  0xea   :  { %v92_v20 = vpack.c.bf16 %v288_v19, %v288_v19 }
  0xec   :  { %271 = vmatmul.mubr.bf16.vlgmr.msra.gmra.mrb[0].mxu1 %v92_v20 }
 0x1bf   :  { %v198_v22 = vpop.f32.mrb[0].mxu1 }
 0x1c0   :  { %v199_v23 = vadd.f32 %v225_v21, %v198_v22  ;;  %v272_v24 = vpop.f32.mrb[1].mxu1 }
 0x1c1   :  { %v201_v25 = vpop.f32.mrb[2].mxu1 }
 0x1c2   :  { %289 = vtanh.f32 %v199_v23  ;;  %v273_v26 = vpop.f32.mrb[3].mxu1 }
 0x1cc   :  { %v290_v27 = vpop.eup %289 }
 0x1cd   :  { %206 = vst.msk [vmem:[#allocation2] sm:$0xff] %vm205_vm2, %v290_v27 }
 0x1ce   :  { %302 = shalt.err (!%p299_p4)
}
 0x1cf   :  { %s303_s19 = scalar_lea.hbm %s404_s5, 128 }
 0x1d0   :  { %p304_p5 = scmp.ne.s32.totalorder %s404_s5, %s303_s19  ;;  %p307_p6 = scmp.lt.u32.totalorder %s303_s19, %s404_s5 }
 0x1d2   :  { %p309_p7 = pnand %p307_p6, %p304_p5 }
 0x1d4   :  { %312 = shalt.err (!%p309_p7)
}
 0x1d5   :  { %216 = dma.vmem_to_hbm [thread:$0]  %s214_s3, 128, %s404_s5, [#allocation3]  }
 0x1d6   :  { %313 = dma.done.wait [#allocation3], 128  }
 0x1d7   :  { %314 = vsyncadd [#allocation3], 4294967168 }
 0x1d8   :  { %220 = vsyncpa [#allocation3], 1 }

</bundles_post_ra>
